<compile_context>
chip_gen: v5e
topology: v5e:2x2
jax: 0.10.0
libtpu: 0.0.40
codegen_flags: <defaults>
</compile_context>

<pallas_src>
import math
from functools import partial

import jax
import jax.numpy as jnp
from jax.experimental import pallas as pl
from jax.experimental.pallas import tpu as pltpu


def _round_up(x, m):
    return (x + m - 1) // m * m


def hybrid_embed_kernel(xp_ref, w1_ref, b1_ref, w2_ref, b2_ref, o_ref):
    # xp_ref: (TM, K1)   bf16 patch rows (one token per row)
    # w1_ref: (K1, F)    bf16 stem weight;      b1_ref: (1, F)     f32
    # w2_ref: (F, E_pad) bf16 proj weight;      b2_ref: (1, E_pad) f32
    # backbone stem: stride-2 conv expressed as a per-patch matmul; bias + ReLU in f32
    # (v5e has no bf16 VPU), accumulation on the MXU in f32.
    feat = jnp.dot(xp_ref[...], w1_ref[...], preferred_element_type=jnp.float32)
    feat = jnp.maximum(feat + b1_ref[...], 0.0)
    # proj: 1x1 conv over the (H', W') feature map == per-token matmul
    out = jnp.dot(feat.astype(w2_ref.dtype), w2_ref[...],
                  preferred_element_type=jnp.float32)
    o_ref[...] = (out + b2_ref[...]).astype(o_ref.dtype)


def _pick_tile_and_vmem(M, K1, F, E_pad, block_tokens):
    """Static tile-size / vmem-limit selection, generation-aware via VMEM capacity."""
    try:
        vmem_cap = int(pltpu.get_tpu_info().vmem_capacity_bytes)
    except Exception:
        vmem_cap = 64 * 1024 * 1024   # conservative (v7x-safe) fallback

    lane = lambda d: _round_up(d, 128)   # VMEM tiles are lane-padded to 128

    def block_bytes(tm):
        in_b = tm * lane(K1) * 2           # bf16 input tile
        out_b = tm * lane(E_pad) * 2       # bf16 output tile
        w_b = (_round_up(K1, 16) * lane(F) * 2 + _round_up(F, 16) * lane(E_pad) * 2
               + 8 * lane(F) * 4 + 8 * lane(E_pad) * 4)
        inter = tm * lane(F) * 4 + tm * lane(F) * 2 + tm * lane(E_pad) * 4
        # 2x on streamed tiles (double-buffered); 2x on weights kept as headroom even
        # though they are requested single-buffered.
        return 2 * in_b + 2 * out_b + 2 * w_b + inter

    # Big tiles amortize the ~0.35us/grid-step overhead (v5e/v6e have 128 MiB VMEM so a
    # 2048-token default is cheap); clamp so the grid keeps >= 2 steps (both v7x cores
    # busy under dimension_semantics=("parallel",)) and so the block fits the VMEM budget.
    budget = vmem_cap // 2
    tm = 2048 if block_tokens is None else int(block_tokens)
    tm = min(_round_up(tm, 16), max(16, _round_up((M + 1) // 2, 16)))
    while tm > 16 and block_bytes(tm) > budget:
        tm = _round_up(tm // 2, 16)

    vmem_limit = int(min(max(32 * 1024 * 1024, 1.5 * block_bytes(tm) + (8 << 20)),
                         0.75 * vmem_cap))
    return tm, vmem_limit


@partial(jax.jit, static_argnames=("stem_k", "tm", "vmem_limit", "out_dtype"))
def _hybrid_embed_tokens(x_nchw, w1, b1, w2, b2, stem_k, tm, vmem_limit, out_dtype):
    B, C, H, W = x_nchw.shape
    Hf, Wf = H // stem_k, W // stem_k
    K1 = stem_k * stem_k * C
    F = w1.shape[1]
    E = w2.shape[1]
    E_pad = _round_up(E, 128)       # lane-dense, unmasked stores; no-op for E % 128 == 0
    M = B * Hf * Wf

    # Single host-side layout pass: cast to bf16 first (halves the copied bytes), then
    # one fused reshape/transpose/reshape into (token, patch) rows. Intentionally bf16
    # streaming data; matmuls accumulate in f32.
    # TODO(synk): with a real NHWC backbone feature map the patch gather could be
    # expressed in the BlockSpec index_map (or a manual in-kernel DMA) and this pass removed.
    xp = x_nchw.astype(jnp.bfloat16).reshape(B, C, Hf, stem_k, Wf, stem_k)
    xp = jnp.transpose(xp, (0, 2, 4, 3, 5, 1)).reshape(M, K1)

    M_pad = _round_up(M, tm)
    if M_pad != M:
        # Only taken when M is not a multiple of the tile; XLA fuses this pad into the
        # preceding transpose copy so it does not add an extra HBM pass.
        xp = jnp.pad(xp, ((0, M_pad - M), (0, 0)))

    # Un-inflated weights (no kron / block-diagonal fold). Prep is O(K1*F + F*E) — tiny.
    w1b = w1.astype(jnp.bfloat16)                                            # (K1, F)
    b1f = b1.astype(jnp.float32).reshape(1, F)                               # (1, F)
    w2b = jnp.zeros((F, E_pad), jnp.bfloat16).at[:, :E].set(w2.astype(jnp.bfloat16))
    b2f = jnp.zeros((1, E_pad), jnp.float32).at[:, :E].set(
        b2.astype(jnp.float32).reshape(1, E))

    grid = (M_pad // tm,)

    cost = pl.CostEstimate(
        flops=int(2 * M_pad * (K1 * F + F * E_pad)),
        transcendentals=0,
        bytes_accessed=int(M_pad * K1 * 2 + M_pad * E_pad * 2
                           + K1 * F * 2 + F * E_pad * 2 + 4 * (F + E_pad)),
    )

    out = pl.pallas_call(
        hybrid_embed_kernel,
        out_shape=jax.ShapeDtypeStruct((M_pad, E_pad), out_dtype),
        grid=grid,
        in_specs=[
            # streamed token tiles (double-buffered by the pipeline)
            pl.BlockSpec((tm, K1), lambda i: (i, 0)),
            # VMEM-resident weights/biases: fetched once, single-buffered
            pl.BlockSpec((K1, F), lambda i: (0, 0), pipeline_mode=pl.Buffered(1)),
            pl.BlockSpec((1, F), lambda i: (0, 0), pipeline_mode=pl.Buffered(1)),
            pl.BlockSpec((F, E_pad), lambda i: (0, 0), pipeline_mode=pl.Buffered(1)),
            pl.BlockSpec((1, E_pad), lambda i: (0, 0), pipeline_mode=pl.Buffered(1)),
        ],
        out_specs=pl.BlockSpec((tm, E_pad), lambda i: (i, 0)),
        compiler_params=pltpu.CompilerParams(
            dimension_semantics=("parallel",),
            vmem_limit_bytes=vmem_limit),
        cost_estimate=cost,
    )(xp, w1b, b1f, w2b, b2f)

    # Drop row padding / zero columns and restore (B, N, E).
    tokens = out[:M, :E].reshape(B, Hf * Wf, E)
    return tokens


def hybrid_embed_with_size(x_nchw, w1, b1, w2, b2, stem_k=2, block_tokens=None,
                           out_dtype=jnp.bfloat16):
    """Returns (tokens (B, N, embed_dim), feat_size (H', W')) matching the PyTorch module."""
    B, C, H, W = x_nchw.shape
    Hf, Wf = H // stem_k, W // stem_k
    K1 = stem_k * stem_k * C
    F = w1.shape[1]
    E_pad = _round_up(w2.shape[1], 128)
    M = B * Hf * Wf
    tm, vmem_limit = _pick_tile_and_vmem(M, K1, F, E_pad, block_tokens)
    tokens = _hybrid_embed_tokens(x_nchw, w1, b1, w2, b2,
                                  stem_k=stem_k, tm=tm, vmem_limit=vmem_limit,
                                  out_dtype=out_dtype)
    return tokens, (Hf, Wf)


def _reference(x_nchw, w1, b1, w2, b2, stem_k=2):
    # Mirrors the kernel's numerics (bf16 streaming data, f32 accumulation / bias / ReLU).
    B, C, H, W = x_nchw.shape
    Hf, Wf = H // stem_k, W // stem_k
    x = x_nchw.astype(jnp.bfloat16).reshape(B, C, Hf, stem_k, Wf, stem_k)
    x = jnp.transpose(x, (0, 2, 4, 3, 5, 1)).reshape(B * Hf * Wf, stem_k * stem_k * C)
    feat = jnp.dot(x, w1.astype(jnp.bfloat16), preferred_element_type=jnp.float32)
    feat = jnp.maximum(feat + b1.reshape(1, -1), 0.0)
    out = jnp.dot(feat.astype(jnp.bfloat16), w2.astype(jnp.bfloat16),
                  preferred_element_type=jnp.float32) + b2.reshape(1, -1)
    return out.reshape(B, Hf * Wf, w2.shape[1]), (Hf, Wf)


if __name__ == "__main__":
    # Small shapes consistent with the module:
    #   in_chans=4, img 16x16, synthetic backbone -> feature map 8x8 with feature_dim=8,
    #   proj: patch_size=1, embed_dim=32  =>  tokens (2, 64, 32), feat_size (8, 8)
    B, C_in, H, W = 2, 4, 16, 16
    stem_k = 2
    feature_dim = 8
    embed_dim = 32

    key = jax.random.PRNGKey(0)
    k_x, k_w1, k_b1, k_w2, k_b2 = jax.random.split(key, 5)
    x = jax.random.normal(k_x, (B, C_in, H, W), jnp.float32)
    # backbone stem conv weight, laid out (kh*kw*Cin, feature_dim); bias (1, feature_dim)
    w1 = jax.random.normal(k_w1, (stem_k * stem_k * C_in, feature_dim), jnp.float32) * 0.1
    b1 = jax.random.normal(k_b1, (1, feature_dim), jnp.float32) * 0.1
    # proj (1x1 conv) weight, laid out (feature_dim, embed_dim); bias (1, embed_dim)
    w2 = jax.random.normal(k_w2, (feature_dim, embed_dim), jnp.float32) * 0.1
    b2 = jax.random.normal(k_b2, (1, embed_dim), jnp.float32) * 0.1

    # block_tokens=32 -> a 4-step grid so the tiny demo exercises the pipelined,
    # multi-step path; the default (auto, >=2 steps) is used for realistic sizes.
    tokens, feat_size = hybrid_embed_with_size(x, w1, b1, w2, b2,
                                               stem_k=stem_k, block_tokens=32)
    tokens = jax.block_until_ready(tokens)

    ref_tokens, ref_size = _reference(x, w1, b1, w2, b2, stem_k=stem_k)
    assert tokens.shape == (B, (H // stem_k) * (W // stem_k), embed_dim), tokens.shape
    assert feat_size == ref_size == (H // stem_k, W // stem_k)
    err = jnp.max(jnp.abs(tokens.astype(jnp.float32) - ref_tokens))
    assert jnp.allclose(tokens.astype(jnp.float32), ref_tokens,
                        atol=2e-2, rtol=2e-2), float(err)

    print("KERNEL_OK")
</pallas_src>

<mosaic_0001>
module attributes {stable_mosaic.version = 11 : i64} {
  func.func @hybrid_embed_kernel(%arg0: i32, %arg1: memref<32x16xbf16, #tpu.memory_space<vmem>>, %arg2: memref<16x8xbf16, #tpu.memory_space<vmem>>, %arg3: memref<1x8xf32, #tpu.memory_space<vmem>>, %arg4: memref<8x128xbf16, #tpu.memory_space<vmem>>, %arg5: memref<1x128xf32, #tpu.memory_space<vmem>>, %arg6: memref<32x128xbf16, #tpu.memory_space<vmem>>) attributes {dimension_semantics = [#tpu.dimension_semantics<parallel>], iteration_bounds = array<i64: 4>, scalar_prefetch = 0 : i64, scratch_operands = 0 : i64, tpu.core_type = #tpu.core_type<tc>, window_params = [{transform_indices = @transform_0, window_bounds = array<i64: 32, 16>}, {pipeline_mode = #tpu.pipeline_mode<synchronous>, transform_indices = @transform_1, window_bounds = array<i64: 16, 8>}, {pipeline_mode = #tpu.pipeline_mode<synchronous>, transform_indices = @transform_2, window_bounds = array<i64: 1, 8>}, {pipeline_mode = #tpu.pipeline_mode<synchronous>, transform_indices = @transform_3, window_bounds = array<i64: 8, 128>}, {pipeline_mode = #tpu.pipeline_mode<synchronous>, transform_indices = @transform_4, window_bounds = array<i64: 1, 128>}, {transform_indices = @transform_5, window_bounds = array<i64: 32, 128>}]} {
    %c0 = arith.constant 0 : index
    %c0_0 = arith.constant 0 : index
    %0 = vector.load %arg1[%c0, %c0_0] : memref<32x16xbf16, #tpu.memory_space<vmem>>, vector<32x16xbf16>
    %c0_1 = arith.constant 0 : index
    %c0_2 = arith.constant 0 : index
    %1 = vector.load %arg2[%c0_1, %c0_2] : memref<16x8xbf16, #tpu.memory_space<vmem>>, vector<16x8xbf16>
    %cst = arith.constant dense<0.000000e+00> : vector<32x8xf32>
    %2 = tpu.matmul %0, %1, %cst {dimension_numbers = #tpu.dot_dimension_numbers<[1], [0], [0], [1], [0, 0, 1, 1], [], []>} : vector<32x16xbf16>, vector<16x8xbf16>, vector<32x8xf32> -> vector<32x8xf32>
    %c0_3 = arith.constant 0 : index
    %c0_4 = arith.constant 0 : index
    %3 = vector.load %arg3[%c0_3, %c0_4] : memref<1x8xf32, #tpu.memory_space<vmem>>, vector<1x8xf32>
    %4 = vector.broadcast %3 : vector<1x8xf32> to vector<32x8xf32>
    %5 = arith.addf %2, %4 : vector<32x8xf32>
    %cst_5 = arith.constant 0.000000e+00 : f32
    %6 = vector.broadcast %cst_5 : f32 to vector<32x8xf32>
    %7 = arith.maximumf %5, %6 : vector<32x8xf32>
    %8 = arith.truncf %7 : vector<32x8xf32> to vector<32x8xbf16>
    %c0_6 = arith.constant 0 : index
    %c0_7 = arith.constant 0 : index
    %9 = vector.load %arg4[%c0_6, %c0_7] : memref<8x128xbf16, #tpu.memory_space<vmem>>, vector<8x128xbf16>
    %cst_8 = arith.constant dense<0.000000e+00> : vector<32x128xf32>
    %10 = tpu.matmul %8, %9, %cst_8 {dimension_numbers = #tpu.dot_dimension_numbers<[1], [0], [0], [1], [0, 0, 1, 1], [], []>} : vector<32x8xbf16>, vector<8x128xbf16>, vector<32x128xf32> -> vector<32x128xf32>
    %c0_9 = arith.constant 0 : index
    %c0_10 = arith.constant 0 : index
    %11 = vector.load %arg5[%c0_9, %c0_10] : memref<1x128xf32, #tpu.memory_space<vmem>>, vector<1x128xf32>
    %12 = vector.broadcast %11 : vector<1x128xf32> to vector<32x128xf32>
    %13 = arith.addf %10, %12 : vector<32x128xf32>
    %14 = arith.truncf %13 : vector<32x128xf32> to vector<32x128xbf16>
    %c0_11 = arith.constant 0 : index
    %c0_12 = arith.constant 0 : index
    %15 = vector.load %arg6[%c0_11, %c0_12] : memref<32x128xbf16, #tpu.memory_space<vmem>>, vector<32x128xbf16>
    tpu.vector_store %arg6[%c0_11, %c0_12], %14 {strides = array<i32>} : memref<32x128xbf16, #tpu.memory_space<vmem>>, vector<32x128xbf16>,
    return
  }
  func.func @transform_0(%arg0: i32) -> (i32, i32) {
    %c0_i32 = arith.constant 0 : i32
    %c0_i32_0 = arith.constant 0 : i32
    return %arg0, %c0_i32 : i32, i32
  }
  func.func @transform_1(%arg0: i32) -> (i32, i32) {
    %c0_i32 = arith.constant 0 : i32
    %c0_i32_0 = arith.constant 0 : i32
    %c0_i32_1 = arith.constant 0 : i32
    return %c0_i32, %c0_i32_0 : i32, i32
  }
  func.func @transform_2(%arg0: i32) -> (i32, i32) {
    %c0_i32 = arith.constant 0 : i32
    %c0_i32_0 = arith.constant 0 : i32
    %c0_i32_1 = arith.constant 0 : i32
    return %c0_i32, %c0_i32_0 : i32, i32
  }
  func.func @transform_3(%arg0: i32) -> (i32, i32) {
    %c0_i32 = arith.constant 0 : i32
    %c0_i32_0 = arith.constant 0 : i32
    %c0_i32_1 = arith.constant 0 : i32
    return %c0_i32, %c0_i32_0 : i32, i32
  }
  func.func @transform_4(%arg0: i32) -> (i32, i32) {
    %c0_i32 = arith.constant 0 : i32
    %c0_i32_0 = arith.constant 0 : i32
    %c0_i32_1 = arith.constant 0 : i32
    return %c0_i32, %c0_i32_0 : i32, i32
  }
  func.func @transform_5(%arg0: i32) -> (i32, i32) {
    %c0_i32 = arith.constant 0 : i32
    %c0_i32_0 = arith.constant 0 : i32
    return %arg0, %c0_i32 : i32, i32
  }
}

</mosaic_0001>

<bundles_post_ra>
// kernel: _hybrid_embed_tokens.1
= control target key start
LH: loop header
LB: loop body
LE: loop exit
PB: predicated region body
PF: predicated region fallthrough
CT: control target
= control target key end

     0   :  { %s477_s18 = smov 0   ;;  %s513_s0 = inlined_call_operand.vmem [shape: bf16[128,16], index: 0, kind: input, shape index: {}]   ;;  %s514_s1 = inlined_call_operand.vmem [shape: bf16[16,8], index: 1, kind: input, shape index: {}]   ;;  %s515_s2 = inlined_call_operand.vmem [shape: f32[1,8], index: 2, kind: input, shape index: {}]   ;;  %s516_s3 = inlined_call_operand.vmem [shape: bf16[8,128], index: 3, kind: input, shape index: {}]   ;;  %s517_s4 = inlined_call_operand.vmem [shape: f32[1,128], index: 4, kind: input, shape index: {}]   ;;  %s518_s5 = inlined_call_operand.vmem [shape: bf16[128,128], index: 5, kind: output, shape index: {}]  }
   0x1 LB: > { %s386_s19 = sadd.s32 4294967295, %s445_s18   ;;  %p390_p0 = scmp.ge.s32.totalorder %s445_s18, 1  ;;  %s445_s18 = sphi %s477_s18, %s15_s18  }
   0x2   : > { %p188_p1 = scmp.lt.s32.totalorder %s445_s18, 5 }
   0x4   : > { %p189_p2 = pnand %p390_p0, %p188_p1 }
   0x5   : > { %s391_s22 = sshll.u32 (!%p189_p2), %s386_s19, 2 }
   0x6   : > { %192 = sbr.rel (%p189_p2) target bundleno = 306 (0x132), region = 40  ;;  %p217_p3 = scmp.lt.s32.totalorder (!%p189_p2), %s391_s22, 15 }
   0xb   : > { %v415_v0 = vld [vmem:[%s514_s1] sm:$0xff]  ;;  %s520_s22 = smov (!%p217_p3, %s391_s22), 15  ;;  %vm255_vm0 = vcmask 130048   ;;  %vm299_vm1 = vcmask 1043456   ;;  %vm292_vm2 = vcmask 64512  }
   0xc   : > { %269 = vmatpush.bf16.msra.mxu0 %v415_v0  ;;  %427 = vmatpush.bf16.msra.mxu2 %v415_v0  ;;  %s392_s23 = sshll.u32 %s520_s22, 2  ;;  %v287_v3 = vld [vmem:[%s516_s3] sm:$0xf] }
   0xd   : > { %s220_s26 = scalar_lea.vmem %s513_s0, %s392_s23  ;;  %v301_v4 = vsel %vm299_vm1, %v287_v3, 0  ;;  %v437_v6 = vld [vmem:[%s515_s2] ss:$0 sm:$0xff]  ;;  %s226_s10 = scalar_lea.vmem %s518_s5, %s392_s23 }
   0xe   : > { %v413_v1 = vld [vmem:[%s220_s26] sm:$0xff]  ;;  %v414_v2 = vld [vmem:[%s220_s26 + $0x8] sm:$0xff]  ;;  %310 = vmatpush.bf16.msra.mxu1 %v301_v4  ;;  %428 = vmatpush.bf16.msra.mxu3 %v301_v4 }
   0xf   : > { %407 = vmatmul.msk.bf16.vlgmr.msra.gmra.mxu0 %vm255_vm0, %v413_v1  ;;  %408 = vmatmul.msk.bf16.vlgmr.msra.gmra.mxu2 %vm255_vm0, %v414_v2  ;;  %v438_v21 = vld [vmem:[%s517_s4] ss:$0 sm:$0xff] }
  0x8c   : > { %v271_v5 = vpop.f32.mrf.mxu0 }
  0x8d   : > { %v272_v7 = vadd.f32 %v437_v6, %v271_v5 }
  0x8f   : > { %v281_v10 = vmax.f32 %v272_v7, 0.0 }
  0x92   : > { %v276_v8 = vpop.f32.mrf.mxu2 }
  0x93   : > { %v277_v13 = vadd.f32 %v437_v6, %v276_v8 }
  0x94   : > { %v273_v9 = vpop.f32.mrf.mxu0 }
  0x95   : > { %v274_v11 = vadd.f32 %v437_v6, %v273_v9  ;;  %v283_v17 = vmax.f32 %v277_v13, 0.0 }
  0x97   : > { %v282_v12 = vmax.f32 %v274_v11, 0.0 }
  0x99   : > { %v285_v14 = vpack.c.bf16 %v282_v12, %v281_v10 }
  0x9a   : > { %v278_v15 = vpop.f32.mrf.mxu2 }
  0x9b   : > { %v279_v16 = vadd.f32 %v437_v6, %v278_v15  ;;  %409 = vmatmul.msk.bf16.vlgmr.msra.gmra.mxu1 %vm292_vm2, %v285_v14 }
  0x9d   : > { %v284_v18 = vmax.f32 %v279_v16, 0.0 }
  0x9f   : > { %v286_v19 = vpack.c.bf16 %v284_v18, %v283_v17 }
  0xa1   : > { %410 = vmatmul.msk.bf16.vlgmr.msra.gmra.mxu3 %vm292_vm2, %v286_v19 }
 0x118   : > { %v312_v20 = vpop.f32.mrf.mxu1 }
 0x119   : > { %v313_v23 = vadd.f32 %v438_v21, %v312_v20 }
 0x120   : > { %v314_v22 = vpop.f32.mrf.mxu1 }
 0x121   : > { %v315_v24 = vadd.f32 %v438_v21, %v314_v22 }
 0x123   : > { %v419_v25 = vpack.c.bf16 %v315_v24, %v313_v23 }
 0x124   : > { %v317_v26 = vpop.f32.mrf.mxu3 }
 0x125   : > { %420 = vst [vmem:[%s226_s10] sm:$0xff] %v419_v25   ;;  %v318_v28 = vadd.f32 %v438_v21, %v317_v26 }
 0x12c   : > { %v319_v27 = vpop.f32.mrf.mxu3 }
 0x12d   : > { %v320_v29 = vadd.f32 %v438_v21, %v319_v27 }
 0x12f   : > { %v424_v30 = vpack.c.bf16 %v320_v29, %v318_v28 }
 0x131   : > { %426 = vst [vmem:[%s226_s10 + $0x8] sm:$0xff] %v424_v30  }
 0x132 PF: > { %s15_s18 = sadd.s32 1, %s445_s18  }
 0x133   : > { %p12_p4 = scmp.ge.s32.totalorder %s15_s18, 6  }
 0x135   :  { %14 = sbr.rel (!%p12_p4) target bundleno = 1 (0x1), region = 70 }

</bundles_post_ra>
